<compile_context>
chip_gen: v5e
topology: v5e:2x2
jax: 0.10.0
libtpu: 0.0.40
codegen_flags: <defaults>
</compile_context>

<pallas_src>
import functools

import jax
import jax.numpy as jnp
from jax.experimental import pallas as pl
from jax.experimental.pallas import tpu as pltpu

_LANES = 128
_TILE_ROWS_MAX = 1024  # (1024,128) f32 block = 512 KiB/input/buffer


def _round_up(x: int, m: int) -> int:
    return ((x + m - 1) // m) * m


def _triplet_loss_kernel(good_ref, bad_ref, out_ref, acc_ref, *,
                         margin: float, n: int, tile_rows: int, steps: int):
    # good_ref / bad_ref: (tile_rows, 128) tiles in VMEM (input dtype).
    # out_ref:            (8, 128) f32 partial-sum tile (one per parallel slice).
    # acc_ref:            (tile_rows, 128) f32 VMEM accumulator scratch.
    p = pl.program_id(0)          # parallel slice (megacore shard on v7x)
    s = pl.program_id(1)          # reduction step

    @pl.when(s == 0)
    def _():
        acc_ref[...] = jnp.zeros_like(acc_ref)

    # Cast to f32 inside the kernel (keeps HBM traffic at the input dtype).
    g = good_ref[...].astype(jnp.float32)
    b = bad_ref[...].astype(jnp.float32)
    hinge = jnp.maximum(jnp.float32(margin) - (g - b), jnp.float32(1e-6))

    # Mask out padded tail elements (global flat index >= n contributes 0).
    row0 = (p * steps + s) * tile_rows
    row_iota = jax.lax.broadcasted_iota(jnp.int32, (tile_rows, _LANES), 0)
    lane_iota = jax.lax.broadcasted_iota(jnp.int32, (tile_rows, _LANES), 1)
    flat_idx = (row0 + row_iota) * _LANES + lane_iota
    acc_ref[...] += jnp.where(flat_idx < n, hinge, 0.0)

    @pl.when(s == steps - 1)
    def _():
        # Fold the accumulator down to a single (8,128) vreg with VPU adds only.
        # The final cross-lane reduce of the tiny partials happens in XLA.
        part = acc_ref[0:8, :]
        for gidx in range(1, tile_rows // 8):
            part = part + acc_ref[gidx * 8:(gidx + 1) * 8, :]
        out_ref[...] = part


def triplet_loss(good_logits: jax.Array, bad_logits: jax.Array, margin: float,
                 *, use_pallas: bool = True) -> jax.Array:
    assert good_logits.shape == bad_logits.shape
    n = good_logits.size

    if not use_pallas:
        # For tiny n the fixed pallas_call/DMA setup cost dominates; plain jnp
        # gets fused into neighboring ops by XLA for free.
        d = good_logits.astype(jnp.float32) - bad_logits.astype(jnp.float32)
        return jnp.mean(jnp.maximum(jnp.float32(margin) - d, jnp.float32(1e-6)))

    flat_g = good_logits.reshape(-1)
    flat_b = bad_logits.reshape(-1)

    # --- host-side layout planning (all static) ---------------------------
    rows = -(-n // _LANES)                       # ceil(n / 128)
    num_partials = 2 if rows >= 512 else 1       # per-core partials on 2-TC parts
    rows_per_partial = -(-rows // num_partials)
    steps = -(-rows_per_partial // _TILE_ROWS_MAX)
    tile_rows = _round_up(-(-rows_per_partial // steps), 16)  # 16: ok for f32/bf16
    rows_padded = num_partials * steps * tile_rows

    pad = rows_padded * _LANES - n
    if pad:
        flat_g = jnp.pad(flat_g, (0, pad))
        flat_b = jnp.pad(flat_b, (0, pad))
    g2 = flat_g.reshape(rows_padded, _LANES)     # original dtype kept
    b2 = flat_b.reshape(rows_padded, _LANES)

    kernel = functools.partial(
        _triplet_loss_kernel,
        margin=float(margin), n=n, tile_rows=tile_rows, steps=steps)

    in_spec = pl.BlockSpec((tile_rows, _LANES), lambda p, s: (p * steps + s, 0))

    partials = pl.pallas_call(
        kernel,
        out_shape=jax.ShapeDtypeStruct((num_partials * 8, _LANES), jnp.float32),
        grid=(num_partials, steps),
        in_specs=[in_spec, in_spec],
        out_specs=pl.BlockSpec((8, _LANES), lambda p, s: (p, 0)),
        scratch_shapes=[pltpu.VMEM((tile_rows, _LANES), jnp.float32)],
        compiler_params=pltpu.CompilerParams(
            dimension_semantics=("parallel", "arbitrary"),
            vmem_limit_bytes=32 * 1024 * 1024,
        ),
    )(g2, b2)

    return jnp.sum(partials) / jnp.float32(n)


def _reference(good_logits, bad_logits, margin):
    d = good_logits.astype(jnp.float32) - bad_logits.astype(jnp.float32)
    return jnp.mean(jnp.maximum(jnp.float32(margin) - d, jnp.float32(1e-6)))


if __name__ == "__main__":
    key = jax.random.PRNGKey(0)
    margin = 1.0

    # --- small case (shape implied by the module: a batch of logits) -------
    k1, k2 = jax.random.split(key)
    batch = 8
    good_small = jax.random.normal(k1, (batch,), dtype=jnp.float32)
    bad_small = jax.random.normal(k2, (batch,), dtype=jnp.float32)

    loss_small = triplet_loss(good_small, bad_small, margin)
    jax.block_until_ready(loss_small)
    ref_small = _reference(good_small, bad_small, margin)
    assert jnp.allclose(loss_small, ref_small, rtol=1e-6, atol=1e-6), (loss_small, ref_small)

    # --- larger case: exercises the multi-step, 2-partial tiled reduction --
    k3, k4 = jax.random.split(k2)
    big_n = 600_000
    good_big = jax.random.normal(k3, (big_n,), dtype=jnp.float32)
    bad_big = jax.random.normal(k4, (big_n,), dtype=jnp.float32)

    loss_big = triplet_loss(good_big, bad_big, margin)
    jax.block_until_ready(loss_big)
    ref_big = _reference(good_big, bad_big, margin)
    assert jnp.allclose(loss_big, ref_big, rtol=1e-4, atol=1e-6), (loss_big, ref_big)

    print("KERNEL_OK")
</pallas_src>

<mosaic_0001>
module attributes {stable_mosaic.version = 11 : i64} {
  func.func @_triplet_loss_kernel(%arg0: i32, %arg1: i32, %arg2: memref<16x128xf32, #tpu.memory_space<vmem>>, %arg3: memref<16x128xf32, #tpu.memory_space<vmem>>, %arg4: memref<8x128xf32, #tpu.memory_space<vmem>>, %arg5: memref<16x128xf32, #tpu.memory_space<vmem>>) attributes {dimension_semantics = [#tpu.dimension_semantics<parallel>, #tpu.dimension_semantics<arbitrary>], iteration_bounds = array<i64: 1, 1>, scalar_prefetch = 0 : i64, scratch_operands = 1 : i64, tpu.core_type = #tpu.core_type<tc>, window_params = [{transform_indices = @transform_0, window_bounds = array<i64: 16, 128>}, {transform_indices = @transform_1, window_bounds = array<i64: 16, 128>}, {transform_indices = @transform_2, window_bounds = array<i64: 8, 128>}]} {
    %c0_i32 = arith.constant 0 : i32
    %0 = arith.cmpi eq, %arg1, %c0_i32 : i32
    %1 = arith.extui %0 : i1 to i32
    %c0_i32_0 = arith.constant 0 : i32
    %2 = arith.cmpi ne, %1, %c0_i32_0 : i32
    scf.if %2 {
      %cst_12 = arith.constant 0.000000e+00 : f32
      %30 = vector.broadcast %cst_12 : f32 to vector<16x128xf32>
      %c0_13 = arith.constant 0 : index
      %c0_14 = arith.constant 0 : index
      %31 = vector.load %arg5[%c0_13, %c0_14] : memref<16x128xf32, #tpu.memory_space<vmem>>, vector<16x128xf32>
      tpu.vector_store %arg5[%c0_13, %c0_14], %30 {strides = array<i32>} : memref<16x128xf32, #tpu.memory_space<vmem>>, vector<16x128xf32>,
    } else {
    }
    %c0 = arith.constant 0 : index
    %c0_1 = arith.constant 0 : index
    %3 = vector.load %arg2[%c0, %c0_1] : memref<16x128xf32, #tpu.memory_space<vmem>>, vector<16x128xf32>
    %c0_2 = arith.constant 0 : index
    %c0_3 = arith.constant 0 : index
    %4 = vector.load %arg3[%c0_2, %c0_3] : memref<16x128xf32, #tpu.memory_space<vmem>>, vector<16x128xf32>
    %5 = arith.subf %3, %4 : vector<16x128xf32>
    %cst = arith.constant 1.000000e+00 : f32
    %6 = vector.broadcast %cst : f32 to vector<16x128xf32>
    %7 = arith.subf %6, %5 : vector<16x128xf32>
    %cst_4 = arith.constant 9.99999997E-7 : f32
    %8 = vector.broadcast %cst_4 : f32 to vector<16x128xf32>
    %9 = arith.maximumf %7, %8 : vector<16x128xf32>
    %c1_i32 = arith.constant 1 : i32
    %10 = arith.muli %arg0, %c1_i32 : i32
    %11 = arith.addi %10, %arg1 : i32
    %c16_i32 = arith.constant 16 : i32
    %12 = arith.muli %11, %c16_i32 : i32
    %13 = tpu.iota {dimensions = array<i32: 0>} : vector<16x128xi32>
    %14 = tpu.iota {dimensions = array<i32: 1>} : vector<16x128xi32>
    %15 = vector.broadcast %12 : i32 to vector<16x128xi32>
    %16 = arith.addi %15, %13 : vector<16x128xi32>
    %c128_i32 = arith.constant 128 : i32
    %17 = vector.broadcast %c128_i32 : i32 to vector<16x128xi32>
    %18 = arith.muli %16, %17 : vector<16x128xi32>
    %19 = arith.addi %18, %14 : vector<16x128xi32>
    %c0_5 = arith.constant 0 : index
    %c0_6 = arith.constant 0 : index
    %20 = vector.load %arg5[%c0_5, %c0_6] : memref<16x128xf32, #tpu.memory_space<vmem>>, vector<16x128xf32>
    %c8_i32 = arith.constant 8 : i32
    %21 = vector.broadcast %c8_i32 : i32 to vector<16x128xi32>
    %22 = arith.cmpi slt, %19, %21 : vector<16x128xi32>
    %cst_7 = arith.constant 0.000000e+00 : f32
    %23 = vector.broadcast %cst_7 : f32 to vector<16x128xf32>
    %24 = arith.select %22, %9, %23 : vector<16x128xi1>, vector<16x128xf32>
    %25 = arith.addf %20, %24 : vector<16x128xf32>
    %c0_8 = arith.constant 0 : index
    %c0_9 = arith.constant 0 : index
    %26 = vector.load %arg5[%c0_8, %c0_9] : memref<16x128xf32, #tpu.memory_space<vmem>>, vector<16x128xf32>
    tpu.vector_store %arg5[%c0_8, %c0_9], %25 {strides = array<i32>} : memref<16x128xf32, #tpu.memory_space<vmem>>, vector<16x128xf32>,
    %c0_i32_10 = arith.constant 0 : i32
    %27 = arith.cmpi eq, %arg1, %c0_i32_10 : i32
    %28 = arith.extui %27 : i1 to i32
    %c0_i32_11 = arith.constant 0 : i32
    %29 = arith.cmpi ne, %28, %c0_i32_11 : i32
    scf.if %29 {
      %c0_12 = arith.constant 0 : index
      %c0_13 = arith.constant 0 : index
      %30 = vector.load %arg5[%c0_12, %c0_13] : memref<16x128xf32, #tpu.memory_space<vmem>>, vector<8x128xf32>
      %c8 = arith.constant 8 : index
      %c0_14 = arith.constant 0 : index
      %31 = vector.load %arg5[%c8, %c0_14] : memref<16x128xf32, #tpu.memory_space<vmem>>, vector<8x128xf32>
      %32 = arith.addf %30, %31 : vector<8x128xf32>
      %c0_15 = arith.constant 0 : index
      %c0_16 = arith.constant 0 : index
      %33 = vector.load %arg4[%c0_15, %c0_16] : memref<8x128xf32, #tpu.memory_space<vmem>>, vector<8x128xf32>
      tpu.vector_store %arg4[%c0_15, %c0_16], %32 {strides = array<i32>} : memref<8x128xf32, #tpu.memory_space<vmem>>, vector<8x128xf32>,
    } else {
    }
    return
  }
  func.func @transform_0(%arg0: i32, %arg1: i32) -> (i32, i32) {
    %c1_i32 = arith.constant 1 : i32
    %0 = arith.muli %arg0, %c1_i32 : i32
    %1 = arith.addi %0, %arg1 : i32
    %c0_i32 = arith.constant 0 : i32
    %c0_i32_0 = arith.constant 0 : i32
    return %1, %c0_i32 : i32, i32
  }
  func.func @transform_1(%arg0: i32, %arg1: i32) -> (i32, i32) {
    %c1_i32 = arith.constant 1 : i32
    %0 = arith.muli %arg0, %c1_i32 : i32
    %1 = arith.addi %0, %arg1 : i32
    %c0_i32 = arith.constant 0 : i32
    %c0_i32_0 = arith.constant 0 : i32
    return %1, %c0_i32 : i32, i32
  }
  func.func @transform_2(%arg0: i32, %arg1: i32) -> (i32, i32) {
    %c0_i32 = arith.constant 0 : i32
    %c0_i32_0 = arith.constant 0 : i32
    return %arg0, %c0_i32 : i32, i32
  }
}

</mosaic_0001>

<bundles_post_ra>
// kernel: tpu_custom_call.1
= control target key start
LH: loop header
LB: loop body
LE: loop exit
PB: predicated region body
PF: predicated region fallthrough
CT: control target
= control target key end

     0   :  { %7 = vsyncpa [#allocation4], 0  ;;  %s233_s0 = inlined_call_operand.hbm [shape: f32[16,128], index: 0, kind: input, shape index: {}]   ;;  %s234_s1 = inlined_call_operand.hbm [shape: f32[16,128], index: 1, kind: input, shape index: {}]   ;;  %s235_s2 = inlined_call_operand.hbm [shape: f32[8,128], index: 2, kind: output, shape index: {}]  }
   0x1   :  { %8 = vsyncpa [#allocation7], 0 }
   0x2   :  { %9 = vsyncpa [#allocation5], 0  ;;  %s18_s11 = sshll.u32 %s233_s0, 4  ;;  %s204_s12 = smov [#allocation3]   ;;  %s19_s11 = int_to_ptr.hbm [resolvable:$true] %s18_s11 }
   0x3   :  { %s20_s13 = sshll.u32 %s204_s12, 4  ;;  %s35_s16 = sshll.u32 %s234_s1, 4  ;;  %s21_s13 = int_to_ptr.vmem [resolvable:$true] %s20_s13  ;;  %s36_s16 = int_to_ptr.hbm [resolvable:$true] %s35_s16 }
   0x4   :  { %s205_s17 = smov 128   ;;  %s206_s18 = smov 8  }
   0x5   :  { %26 = dma.hbm_to_vmem [thread:$0]  %s19_s11, 256, %s21_s13, [#allocation4], %s205_s17, %s205_s17, %s206_s18  }
   0x6   :  { %s207_s19 = smov [#allocation6]  }
   0x7   :  { %s37_s20 = sshll.u32 %s207_s19, 4  ;;  %s38_s20 = int_to_ptr.vmem [resolvable:$true] %s37_s20 }
   0x8   :  { %43 = dma.hbm_to_vmem [thread:$0]  %s36_s16, 256, %s38_s20, [#allocation7], %s205_s17, %s205_s17, %s206_s18  }
   0x9   :  { %198 = dma.done.wait [#allocation4], 256  }
   0xa   :  { %199 = vsyncadd [#allocation4], 4294967040 }
   0xb   :  { %200 = dma.done.wait [#allocation7], 256  }
   0xc   :  { %201 = vsyncadd [#allocation7], 4294967040  ;;  %v74_v0 = vlaneseq  ;;  %v62_v6 = vld [vmem:[#allocation3] sm:$0xff]  ;;  %v63_v7 = vld [vmem:[#allocation3 + $0x8] sm:$0xff]  ;;  %s208_s0 = smov [#allocation8]   ;;  %s110_s23 = sshll.u32 %s235_s2, 4  ;;  %s111_s23 = int_to_ptr.hbm [resolvable:$true] %s110_s23 }
   0xd   :  { %v64_v8 = vld [vmem:[#allocation6] sm:$0xff]  ;;  %v65_v10 = vld [vmem:[#allocation6 + $0x8] sm:$0xff]  ;;  %s108_s1 = sshll.u32 %s208_s0, 4  ;;  %s109_s1 = int_to_ptr.vmem [resolvable:$true] %s108_s1 }
   0xe   :  { %v75_v1 = vshrl.u32 %v74_v0, 7  ;;  %v78_v2 = vand.u32 127, %v74_v0  ;;  %v66_v11 = vsub.f32 %v62_v6, %v64_v8  ;;  %v67_v13 = vsub.f32 %v63_v7, %v65_v10 }
  0x10   :  { %v76_v3 = vadd.s32 8, %v75_v1  ;;  %v82_v4 = vmul.u32 128, %v75_v1  ;;  %v68_v14 = vsub.f32 1.0, %v66_v11  ;;  %v69_v15 = vsub.f32 1.0, %v67_v13 }
  0x12   :  { %v83_v5 = vmul.u32 128, %v76_v3  ;;  %v84_v9 = vadd.s32 %v82_v4, %v78_v2  ;;  %v70_v16 = vmax.f32 %v68_v14, 1e-06  ;;  %v71_v17 = vmax.f32 %v69_v15, 1e-06 }
  0x14   :  { %v85_v12 = vadd.s32 %v83_v5, %v78_v2  ;;  %vm88_vm0 = vcmp.lt.s32.totalorder %v84_v9, 8 }
  0x15   :  { %v90_v18 = vsel %vm88_vm0, %v70_v16, 0.0 }
  0x16   :  { %vm89_vm1 = vcmp.lt.s32.totalorder %v85_v12, 8 }
  0x17   :  { %v91_v19 = vsel %vm89_vm1, %v71_v17, 0.0 }
  0x18   :  { %v101_v20 = vadd.f32 %v91_v19, %v90_v18 }
  0x1a   :  { %102 = vst [vmem:[#allocation8] sm:$0xff] %v101_v20 }
  0x1b   :  { %113 = dma.vmem_to_hbm [thread:$0]  %s109_s1, 128, %s111_s23, [#allocation5]  }
  0x1c   :  { %202 = dma.done.wait [#allocation5], 128  }
  0x1d   :  { %203 = vsyncadd [#allocation5], 4294967168 }
  0x1e   :  { %118 = vsyncpa [#allocation4], 1 }
  0x1f   :  { %119 = vsyncpa [#allocation7], 1 }
  0x20   :  { %120 = vsyncpa [#allocation5], 1 }

</bundles_post_ra>
